<compile_context>
chip_gen: v7x
topology: tpu7x:2x2x1
jax: 0.10.0
libtpu: 0.0.40
codegen_flags: <defaults>
</compile_context>

<pallas_src>
import math
from functools import partial

import jax
import jax.numpy as jnp
from jax.experimental import pallas as pl
from jax.experimental.pallas import tpu as pltpu

INPUT_SIZE = 1      # forward() builds its input from a single scalar otp1
HIDDEN1 = 120
HIDDEN2 = 84
OUTPUT_SIZE = 4     # small example output size
LANE = 128
SUBLANE = 8
H1P = 128           # HIDDEN1 zero-padded to lane width
H2P = 128           # HIDDEN2 zero-padded to lane width


def _round_up(x, m):
    return ((x + m - 1) // m) * m


def _cdiv(a, b):
    return (a + b - 1) // b


def _qmyopic_kernel(x_ref, vec_ref, w2t_ref, w3t_ref, o_ref, *, out_rows):
    # x_ref:   (1, tb)          f32   batch of scalar observations (lane-dense row)
    # vec_ref: (128, 8)         f32   packed columns: [w1, b1, b2, b3, 0, ...]
    # w2t_ref: (128, 128)       bf16  fc2 weight, transposed + zero-padded
    # w3t_ref: (out_rows, 128)  bf16  out weight, transposed + zero-padded
    # o_ref:   (out_rows, tb)   f32   narrow lane-dense output slab
    x = x_ref[...]
    vec = vec_ref[...]
    w1c = vec[:, 0:1]                  # (128, 1)
    b1c = vec[:, 1:2]                  # (128, 1)
    b2c = vec[:, 2:3]                  # (128, 1)
    b3c = vec[:out_rows, 3:4]          # (out_rows, 1)

    # fc1 has K=1, so it is a pure VPU broadcast-multiply + ReLU (no MXU pass).
    # Padded rows (120..127) stay exactly 0 since w1/b1 padding is 0.
    h1 = jnp.maximum(w1c * x + b1c, 0.0)                        # (128, tb) f32

    # fc2 + tanh: one 128-K bf16 MXU pass, f32 accumulate, EUP tanh.
    # Padded rows (84..127) stay 0 (zero weight rows, zero bias, tanh(0)=0).
    h2 = jnp.tanh(
        jnp.dot(w2t_ref[...], h1.astype(jnp.bfloat16),
                preferred_element_type=jnp.float32) + b2c)      # (128, tb) f32

    # Output layer: narrow (out_rows, tb) unmasked lane-dense store.
    o_ref[...] = (
        jnp.dot(w3t_ref[...], h2.astype(jnp.bfloat16),
                preferred_element_type=jnp.float32) + b3c)


def init_params(key, input_size=INPUT_SIZE, output_size=OUTPUT_SIZE):
    """nn.Linear-style init (uniform +-1/sqrt(fan_in)); weights stored (in, out)."""
    def linear(k, fan_in, fan_out):
        kw, kb = jax.random.split(k)
        bound = 1.0 / math.sqrt(fan_in)
        w = jax.random.uniform(kw, (fan_in, fan_out), jnp.float32, -bound, bound)
        b = jax.random.uniform(kb, (1, fan_out), jnp.float32, -bound, bound)
        return w, b

    k1, k2, k3 = jax.random.split(key, 3)
    w1, b1 = linear(k1, input_size, HIDDEN1)
    w2, b2 = linear(k2, HIDDEN1, HIDDEN2)
    w3, b3 = linear(k3, HIDDEN2, output_size)
    return (w1, b1, w2, b2, w3, b3)


def pack_params(params):
    """Repack parameters for the transposed kernel layout (done once, host side).

    Returns:
      vec_params: (128, 8) f32  -- columns [w1, b1, b2, b3], zero-padded.
      w2t:        (128, 128) bf16 -- fc2 weight transposed, zero-padded.
      w3t:        (out_rows, 128) bf16 -- out weight transposed, zero-padded.
    """
    w1, b1, w2, b2, w3, b3 = params
    assert w1.shape[0] == 1, "forward() feeds a single scalar otp1 (input_size == 1)"
    output_size = w3.shape[1]
    assert output_size <= H2P, "output_size too large for this packing scheme"
    out_rows = _round_up(output_size, SUBLANE)

    vec = jnp.zeros((H1P, SUBLANE), jnp.float32)
    vec = vec.at[:HIDDEN1, 0].set(w1[0].astype(jnp.float32))   # fc1 weight column
    vec = vec.at[:HIDDEN1, 1].set(b1[0].astype(jnp.float32))   # fc1 bias column
    vec = vec.at[:HIDDEN2, 2].set(b2[0].astype(jnp.float32))   # fc2 bias column
    vec = vec.at[:output_size, 3].set(b3[0].astype(jnp.float32))  # out bias column

    w2t = jnp.zeros((H2P, H1P), jnp.float32).at[:HIDDEN2, :HIDDEN1].set(
        w2.astype(jnp.float32).T)
    w3t = jnp.zeros((out_rows, H2P), jnp.float32).at[:output_size, :HIDDEN2].set(
        w3.astype(jnp.float32).T)
    return vec, w2t.astype(jnp.bfloat16), w3t.astype(jnp.bfloat16)


@partial(jax.jit, static_argnames=("output_size", "batch_tile"))
def qmyopic_forward_batched(otp1, packed, output_size=OUTPUT_SIZE, batch_tile=2048):
    """Batched forward over a vector of scalar observations -> (B, output_size)."""
    vec, w2t, w3t = packed
    otp1 = jnp.asarray(otp1, jnp.float32).reshape(-1)
    b = otp1.shape[0]
    if b == 0:                                   # guard grid=(0,) edge case
        return jnp.zeros((0, output_size), jnp.float32)
    out_rows = w3t.shape[0]

    # Batch tile: lane-dense (multiple of 128).  For big batches keep >= 2 grid
    # steps so v7x's two TensorCores both get a share of the "parallel" axis,
    # capped at batch_tile so per-step work amortizes pipeline overhead.
    b_min = _round_up(b, LANE)
    if b_min <= LANE:
        tb = b_min
    else:
        tb = min(batch_tile, _round_up(_cdiv(b_min, 2), LANE))
    b_pad = _round_up(b_min, tb)

    x = otp1.reshape(1, b)
    if b_pad != b:                               # pad only when actually needed
        x = jnp.pad(x, ((0, 0), (0, b_pad - b)))

    flops = 2 * b_pad * (H1P * H2P + H2P * out_rows) + 4 * b_pad * H1P
    bytes_accessed = (4 * (b_pad + out_rows * b_pad + H1P * SUBLANE)
                      + 2 * (H2P * H1P + out_rows * H2P))

    out = pl.pallas_call(
        partial(_qmyopic_kernel, out_rows=out_rows),
        out_shape=jax.ShapeDtypeStruct((out_rows, b_pad), jnp.float32),
        grid=(b_pad // tb,),
        in_specs=[
            pl.BlockSpec((1, tb), lambda i: (0, i)),      # x: lane-dense row tile
            pl.BlockSpec(vec.shape, lambda i: (0, 0)),    # packed small params (resident)
            pl.BlockSpec(w2t.shape, lambda i: (0, 0)),    # fc2 weight (resident)
            pl.BlockSpec(w3t.shape, lambda i: (0, 0)),    # out weight (resident)
        ],
        out_specs=pl.BlockSpec((out_rows, tb), lambda i: (0, i)),
        compiler_params=pltpu.CompilerParams(
            dimension_semantics=("parallel",),            # v7x: TCs split the batch
        ),
        cost_estimate=pl.CostEstimate(
            flops=flops, transcendentals=b_pad * H2P, bytes_accessed=bytes_accessed),
    )(x, vec, w2t, w3t)

    # Narrow (out_rows, b_pad) slab -> module layout (B, output_size); tiny copy.
    return out[:output_size, :b].T


def qmyopic_forward(otp1, packed, output_size=OUTPUT_SIZE):
    """Module-equivalent scalar forward: returns (1, output_size)."""
    return qmyopic_forward_batched(
        jnp.asarray(otp1, jnp.float32).reshape(1), packed, output_size=output_size)


def _reference_forward(otp1, params):
    w1, b1, w2, b2, w3, b3 = params
    x = jnp.asarray(otp1, jnp.float32).reshape(-1, 1)
    h1 = jnp.maximum(x @ w1 + b1, 0.0)
    h2 = jnp.tanh(h1 @ w2 + b2)
    return h2 @ w3 + b3


if __name__ == "__main__":
    key = jax.random.PRNGKey(0)
    kp, kx = jax.random.split(key)

    params = init_params(kp)
    packed = pack_params(params)

    # Small deterministic batch of scalar observations.
    batch = 8
    otp1_batch = jax.random.uniform(kx, (batch,), jnp.float32)

    out = jax.block_until_ready(qmyopic_forward_batched(otp1_batch, packed))
    ref = _reference_forward(otp1_batch, params)
    assert out.shape == (batch, OUTPUT_SIZE), out.shape
    # bf16 MXU operands (f32 accumulate) -> loosened tolerance vs. the f32 reference.
    assert jnp.allclose(out, ref, atol=5e-2, rtol=5e-2), (out, ref)

    # Module-equivalent single-scalar path.
    out1 = jax.block_until_ready(qmyopic_forward(float(otp1_batch[0]), packed))
    assert out1.shape == (1, OUTPUT_SIZE), out1.shape
    assert jnp.allclose(out1, ref[0:1], atol=5e-2, rtol=5e-2), (out1, ref[0:1])

    print("KERNEL_OK")
</pallas_src>

<mosaic_0001>
module attributes {stable_mosaic.version = 11 : i64} {
  func.func @_qmyopic_kernel(%arg0: i32, %arg1: memref<1x128xf32, #tpu.memory_space<vmem>>, %arg2: memref<128x8xf32, #tpu.memory_space<vmem>>, %arg3: memref<128x128xbf16, #tpu.memory_space<vmem>>, %arg4: memref<8x128xbf16, #tpu.memory_space<vmem>>, %arg5: memref<8x128xf32, #tpu.memory_space<vmem>>) attributes {dimension_semantics = [#tpu.dimension_semantics<parallel>], iteration_bounds = array<i64: 1>, scalar_prefetch = 0 : i64, scratch_operands = 0 : i64, tpu.core_type = #tpu.core_type<tc>, window_params = [{transform_indices = @transform_0, window_bounds = array<i64: 1, 128>}, {pipeline_mode = #tpu.pipeline_mode<synchronous>, transform_indices = @transform_1, window_bounds = array<i64: 128, 8>}, {pipeline_mode = #tpu.pipeline_mode<synchronous>, transform_indices = @transform_2, window_bounds = array<i64: 128, 128>}, {pipeline_mode = #tpu.pipeline_mode<synchronous>, transform_indices = @transform_3, window_bounds = array<i64: 8, 128>}, {transform_indices = @transform_4, window_bounds = array<i64: 8, 128>}]} {
    %c0 = arith.constant 0 : index
    %c0_0 = arith.constant 0 : index
    %0 = vector.load %arg1[%c0, %c0_0] : memref<1x128xf32, #tpu.memory_space<vmem>>, vector<1x128xf32>
    %c0_1 = arith.constant 0 : index
    %c0_2 = arith.constant 0 : index
    %1 = vector.load %arg2[%c0_1, %c0_2] : memref<128x8xf32, #tpu.memory_space<vmem>>, vector<128x8xf32>
    %2 = vector.extract_strided_slice %1 {offsets = [0, 0], sizes = [128, 1], strides = [1, 1]} : vector<128x8xf32> to vector<128x1xf32>
    %3 = vector.extract_strided_slice %1 {offsets = [0, 1], sizes = [128, 1], strides = [1, 1]} : vector<128x8xf32> to vector<128x1xf32>
    %4 = vector.extract_strided_slice %1 {offsets = [0, 2], sizes = [128, 1], strides = [1, 1]} : vector<128x8xf32> to vector<128x1xf32>
    %5 = vector.extract_strided_slice %1 {offsets = [0, 3], sizes = [8, 1], strides = [1, 1]} : vector<128x8xf32> to vector<8x1xf32>
    %6 = vector.broadcast %2 : vector<128x1xf32> to vector<128x128xf32>
    %7 = vector.broadcast %0 : vector<1x128xf32> to vector<128x128xf32>
    %8 = arith.mulf %6, %7 : vector<128x128xf32>
    %9 = vector.broadcast %3 : vector<128x1xf32> to vector<128x128xf32>
    %10 = arith.addf %8, %9 : vector<128x128xf32>
    %cst = arith.constant 0.000000e+00 : f32
    %11 = vector.broadcast %cst : f32 to vector<128x128xf32>
    %12 = arith.maximumf %10, %11 : vector<128x128xf32>
    %c0_3 = arith.constant 0 : index
    %c0_4 = arith.constant 0 : index
    %13 = vector.load %arg3[%c0_3, %c0_4] : memref<128x128xbf16, #tpu.memory_space<vmem>>, vector<128x128xbf16>
    %14 = arith.truncf %12 : vector<128x128xf32> to vector<128x128xbf16>
    %cst_5 = arith.constant dense<0.000000e+00> : vector<128x128xf32>
    %15 = tpu.matmul %13, %14, %cst_5 {dimension_numbers = #tpu.dot_dimension_numbers<[1], [0], [0], [1], [0, 0, 1, 1], [], []>} : vector<128x128xbf16>, vector<128x128xbf16>, vector<128x128xf32> -> vector<128x128xf32>
    %16 = vector.broadcast %4 : vector<128x1xf32> to vector<128x128xf32>
    %17 = arith.addf %15, %16 : vector<128x128xf32>
    %18 = math.tanh %17 : vector<128x128xf32>
    %c0_6 = arith.constant 0 : index
    %c0_7 = arith.constant 0 : index
    %19 = vector.load %arg4[%c0_6, %c0_7] : memref<8x128xbf16, #tpu.memory_space<vmem>>, vector<8x128xbf16>
    %20 = arith.truncf %18 : vector<128x128xf32> to vector<128x128xbf16>
    %cst_8 = arith.constant dense<0.000000e+00> : vector<8x128xf32>
    %21 = tpu.matmul %19, %20, %cst_8 {dimension_numbers = #tpu.dot_dimension_numbers<[1], [0], [0], [1], [0, 0, 1, 1], [], []>} : vector<8x128xbf16>, vector<128x128xbf16>, vector<8x128xf32> -> vector<8x128xf32>
    %22 = vector.broadcast %5 : vector<8x1xf32> to vector<8x128xf32>
    %23 = arith.addf %21, %22 : vector<8x128xf32>
    %c0_9 = arith.constant 0 : index
    %c0_10 = arith.constant 0 : index
    %24 = vector.load %arg5[%c0_9, %c0_10] : memref<8x128xf32, #tpu.memory_space<vmem>>, vector<8x128xf32>
    tpu.vector_store %arg5[%c0_9, %c0_10], %23 {strides = array<i32>} : memref<8x128xf32, #tpu.memory_space<vmem>>, vector<8x128xf32>,
    return
  }
  func.func @transform_0(%arg0: i32) -> (i32, i32) {
    %c0_i32 = arith.constant 0 : i32
    %c0_i32_0 = arith.constant 0 : i32
    return %c0_i32, %arg0 : i32, i32
  }
  func.func @transform_1(%arg0: i32) -> (i32, i32) {
    %c0_i32 = arith.constant 0 : i32
    %c0_i32_0 = arith.constant 0 : i32
    %c0_i32_1 = arith.constant 0 : i32
    return %c0_i32, %c0_i32_0 : i32, i32
  }
  func.func @transform_2(%arg0: i32) -> (i32, i32) {
    %c0_i32 = arith.constant 0 : i32
    %c0_i32_0 = arith.constant 0 : i32
    %c0_i32_1 = arith.constant 0 : i32
    return %c0_i32, %c0_i32_0 : i32, i32
  }
  func.func @transform_3(%arg0: i32) -> (i32, i32) {
    %c0_i32 = arith.constant 0 : i32
    %c0_i32_0 = arith.constant 0 : i32
    %c0_i32_1 = arith.constant 0 : i32
    return %c0_i32, %c0_i32_0 : i32, i32
  }
  func.func @transform_4(%arg0: i32) -> (i32, i32) {
    %c0_i32 = arith.constant 0 : i32
    %c0_i32_0 = arith.constant 0 : i32
    return %c0_i32, %arg0 : i32, i32
  }
}

</mosaic_0001>

<bundles_post_ra>
// kernel: qmyopic_forward_batched.1
= control target key start
LH: loop header
LB: loop body
LE: loop exit
PB: predicated region body
PF: predicated region fallthrough
CT: control target
= control target key end

     0   :  { %v693_v0 = vmov 1   ;;  %v694_v7 = vmov 0   ;;  %v695_v19 = vmov 2   ;;  %vm697_vm0 = vmmov 0   ;;  %s881_s1 = inlined_call_operand.vmem [shape: f32[128,8], index: 1, kind: input, shape index: {}]   ;;  %s882_s2 = inlined_call_operand.vmem [shape: bf16[128,128], index: 2, kind: input, shape index: {}]   ;;  %s883_s0 = inlined_call_operand.vmem [shape: f32[1,128], index: 0, kind: input, shape index: {}]   ;;  %s884_s3 = inlined_call_operand.vmem [shape: bf16[8,128], index: 3, kind: input, shape index: {}]   ;;  %s885_s4 = inlined_call_operand.vmem [shape: f32[8,128], index: 4, kind: output, shape index: {}]  }
   0x1   :  { %634 = vset.pattern.permute.xlu0 %v693_v0  ;;  %632 = vset.pattern.permute.xlu1 %v693_v0  ;;  %v729_v1 = vld [vmem:[%s881_s1 + $0x10] sm:$0xff]  ;;  %v734_v2 = vld [vmem:[%s881_s1] sm:$0xff]  ;;  %v746_v4 = vld [vmem:[%s881_s1 + $0x8] sm:$0xff] }
   0x2   :  { %146 = vperm.xlu0 %634, %v729_v1   ;;  %138 = vperm.xlu1 %632, %v734_v2   ;;  %v741_v3 = vld [vmem:[%s881_s1 + $0x30] sm:$0xff]  ;;  %v758_v6 = vld [vmem:[%s881_s1 + $0x18] sm:$0xff]  ;;  %v23_v8 = vld [vmem:[%s881_s1 + $0x20] sm:$0xff] }
   0x3   :  { %v753_v5 = vld [vmem:[%s881_s1 + $0x50] sm:$0xff]  ;;  %v24_v9 = vld [vmem:[%s881_s1 + $0x28] sm:$0xff]  ;;  %v26_v11 = vld [vmem:[%s881_s1 + $0x38] sm:$0xff] }
   0x4   :  { %v28_v10 = vld [vmem:[%s881_s1 + $0x48] sm:$0xff]  ;;  %v27_v13 = vld [vmem:[%s881_s1 + $0x40] sm:$0xff]  ;;  %v33_v14 = vld [vmem:[%s881_s1 + $0x70] sm:$0xff] }
   0x5   :  { %v786_v12 = vld [vmem:[%s881_s1 + $0x68] sm:$0xff]  ;;  %v30_v15 = vld [vmem:[%s881_s1 + $0x58] sm:$0xff]  ;;  %v31_v16 = vld [vmem:[%s881_s1 + $0x60] sm:$0xff] }
   0x6   :  { %162 = vperm.xlu0 %634, %v741_v3   ;;  %142 = vperm.xlu1 %632, %v746_v4   ;;  %v34_v17 = vld [vmem:[%s881_s1 + $0x78] sm:$0xff]  ;;  %v653_v18 = vld [vmem:[%s882_s2] sm:$0xff]  }
   0x7   :  { %590 = vmatprep.mubr.bf16.mxu0 %v653_v18  ;;  %v824_v26 = vld [vmem:[%s883_s0] ss:$0 sm:$0xff] }
   0xa   :  { %178 = vperm.xlu0 %634, %v753_v5   ;;  %633 = vset.pattern.permute.xlu1 %v694_v7 }
   0xb   :  { %52 = vperm.xlu1 %633, %v758_v6  }
   0xe   :  { %643 = vset.pattern.permute.xlu0 %v694_v7 }
   0xf   :  { %37 = vperm.xlu0 %643, %v734_v2   ;;  %635 = vset.pattern.permute.xlu1 %v693_v0 }
  0x10   :  { %150 = vperm.xlu1 %635, %v758_v6  }
  0x13   :  { %42 = vperm.xlu0 %643, %v746_v4  }
  0x14   :  { %636 = vset.pattern.permute.xlu1 %v694_v7 }
  0x15   :  { %57 = vperm.xlu1 %636, %v23_v8  }
  0x17   :  { %47 = vperm.xlu0 %643, %v729_v1  }
  0x19   :  { %637 = vset.pattern.permute.xlu1 %v693_v0 }
  0x1a   :  { %154 = vperm.xlu1 %637, %v23_v8  }
  0x1b   :  { %62 = vperm.xlu0 %643, %v24_v9  }
  0x1e   :  { %158 = vperm.xlu1 %637, %v24_v9  }
  0x1f   :  { %67 = vperm.xlu0 %643, %v741_v3  }
  0x22   :  { %638 = vset.pattern.permute.xlu1 %v694_v7 }
  0x23   :  { %82 = vperm.xlu0 %643, %v28_v10   ;;  %72 = vperm.xlu1 %638, %v26_v11  }
  0x27   :  { %87 = vperm.xlu0 %643, %v753_v5   ;;  %639 = vset.pattern.permute.xlu1 %v693_v0 }
  0x28   :  { %166 = vperm.xlu1 %639, %v26_v11  }
  0x2b   :  { %102 = vperm.xlu0 %643, %v786_v12  }
  0x2c   :  { %640 = vset.pattern.permute.xlu1 %v694_v7 }
  0x2d   :  { %77 = vperm.xlu1 %640, %v27_v13  }
  0x2f   :  { %107 = vperm.xlu0 %643, %v33_v14  }
  0x31   :  { %641 = vset.pattern.permute.xlu1 %v693_v0 }
  0x32   :  { %170 = vperm.xlu1 %641, %v27_v13  }
  0x33   :  { %648 = vset.pattern.permute.xlu0 %v693_v0 }
  0x34   :  { %194 = vperm.xlu0 %648, %v33_v14  }
  0x36   :  { %174 = vperm.xlu1 %641, %v28_v10  }
  0x38   :  { %651 = vset.pattern.permute.xlu0 %v695_v19 }
  0x39   :  { %262 = vperm.xlu0 %651, %v746_v4  }
  0x3a   :  { %642 = vset.pattern.permute.xlu1 %v694_v7 }
  0x3b   :  { %92 = vperm.xlu1 %642, %v30_v15  }
  0x3d   :  { %274 = vperm.xlu0 %651, %v23_v8  }
  0x3f   :  { %644 = vset.pattern.permute.xlu1 %v693_v0 }
  0x40   :  { %182 = vperm.xlu1 %644, %v30_v15  }
  0x41   :  { %282 = vperm.xlu0 %651, %v741_v3  }
  0x44   :  { %645 = vset.pattern.permute.xlu1 %v694_v7 }
  0x45   :  { %97 = vperm.xlu1 %645, %v31_v16   ;;  %290 = vperm.xlu0 %651, %v27_v13  }
  0x49   :  { %646 = vset.pattern.permute.xlu1 %v693_v0  ;;  %298 = vperm.xlu0 %651, %v753_v5  }
  0x4a   :  { %186 = vperm.xlu1 %646, %v31_v16  }
  0x4d   :  { %306 = vperm.xlu0 %651, %v31_v16  }
  0x4e   :  { %190 = vperm.xlu1 %646, %v786_v12  }
  0x51   :  { %314 = vperm.xlu0 %651, %v33_v14  }
  0x52   :  { %647 = vset.pattern.permute.xlu1 %v694_v7 }
  0x53   :  { %112 = vperm.xlu1 %647, %v34_v17  }
  0x57   :  { %649 = vset.pattern.permute.xlu1 %v693_v0 }
  0x58   :  { %198 = vperm.xlu1 %649, %v34_v17  }
  0x5c   :  { %650 = vset.pattern.permute.xlu1 %v695_v19 }
  0x5d   :  { %258 = vperm.xlu1 %650, %v734_v2  }
  0x61   :  { %266 = vperm.xlu1 %650, %v729_v1  }
  0x65   :  { %270 = vperm.xlu1 %650, %v758_v6  }
  0x69   :  { %278 = vperm.xlu1 %650, %v24_v9  }
  0x6d   :  { %286 = vperm.xlu1 %650, %v26_v11  }
  0x71   :  { %294 = vperm.xlu1 %650, %v28_v10  }
  0x75   :  { %302 = vperm.xlu1 %650, %v30_v15  }
  0x79   :  { %310 = vperm.xlu1 %650, %v786_v12  }
  0x7d   :  { %318 = vperm.xlu1 %650, %v34_v17  }
  0x81   :  { %v139_v20 = vpop.permute.xlu1 %138  ;;  %v147_v21 = vpop.permute.xlu0 %146 }
  0x85   :  { %v143_v22 = vpop.permute.xlu1 %142  ;;  %v163_v23 = vpop.permute.xlu0 %162 }
  0x89   :  { %v818_v24 = vpop.permute.xlu0 %178 }
  0x8a   :  { %v53_v25 = vpop.permute.xlu1 %52 }
  0x8b   :  { %v124_v34 = vmul.f32 %v824_v26, %v53_v25 }
  0x8e   :  { %v38_v27 = vpop.permute.xlu0 %37 }
  0x8f   :  { %v121_v28 = vmul.f32 %v824_v26, %v38_v27  ;;  %v151_v29 = vpop.permute.xlu1 %150 }
  0x90   :  { %v204_v38 = vadd.f32 %v151_v29, %v124_v34 }
  0x91   :  { %v201_v31 = vadd.f32 %v139_v20, %v121_v28 }
  0x92   :  { %v43_v30 = vpop.permute.xlu0 %42  ;;  %v220_v46 = vmax.f32 %v204_v38, 0.0 }
  0x93   :  { %v122_v32 = vmul.f32 %v824_v26, %v43_v30  ;;  %v217_v37 = vmax.f32 %v201_v31, 0.0 }
  0x94   :  { %v58_v33 = vpop.permute.xlu1 %57 }
  0x95   :  { %v202_v35 = vadd.f32 %v143_v22, %v122_v32  ;;  %v125_v44 = vmul.f32 %v824_v26, %v58_v33 }
  0x96   :  { %v48_v36 = vpop.permute.xlu0 %47 }
  0x97   :  { %v218_v39 = vmax.f32 %v202_v35, 0.0  ;;  %v123_v40 = vmul.f32 %v824_v26, %v48_v36 }
  0x99   :  { %v203_v41 = vadd.f32 %v147_v21, %v123_v40  ;;  %v155_v42 = vpop.permute.xlu1 %154  ;;  %v249_v43 = vpack.c.bf16 %v218_v39, %v217_v37 }
  0x9a   :  { %v63_v45 = vpop.permute.xlu0 %62  ;;  %v205_v49 = vadd.f32 %v155_v42, %v125_v44 }
  0x9b   :  { %v219_v47 = vmax.f32 %v203_v41, 0.0  ;;  %v126_v48 = vmul.f32 %v824_v26, %v63_v45  ;;  %574 = vmatprep.subr.bf16.mxu0 %v249_v43 }
  0x9c   :  { %575 = vmatpush3.bf16.msra.mxu0 %v249_v43  ;;  %v221_v53 = vmax.f32 %v205_v49, 0.0  ;;  %v657_v49 = vld [vmem:[%s882_s2 + $0x20] sm:$0xff]  }
  0x9d   :  { %v159_v50 = vpop.permute.xlu1 %158  ;;  %v250_v51 = vpack.c.bf16 %v220_v46, %v219_v47  ;;  %v654_v47 = vld [vmem:[%s882_s2 + $0x8] sm:$0xff]  }
  0x9e   :  { %v206_v52 = vadd.f32 %v159_v50, %v126_v48  ;;  %v68_v55 = vpop.permute.xlu0 %67  ;;  %v655_v48 = vld [vmem:[%s882_s2 + $0x10] sm:$0xff]   ;;  %v658_v50 = vld [vmem:[%s882_s2 + $0x28] sm:$0xff]  }
  0x9f   :  { %576 = vmatprep.subr.bf16.mxu0 %v250_v51  ;;  %v127_v57 = vmul.f32 %v824_v26, %v68_v55 }
  0xa0   :  { %v222_v54 = vmax.f32 %v206_v52, 0.0  ;;  %577 = vmatpush3.bf16.msra.mxu0 %v250_v51  ;;  %v659_v51 = vld [vmem:[%s882_s2 + $0x30] sm:$0xff]   ;;  %v660_v52 = vld [vmem:[%s882_s2 + $0x38] sm:$0xff]  }
  0xa1   :  { %v207_v59 = vadd.f32 %v163_v23, %v127_v57 }
  0xa2   :  { %v251_v56 = vpack.c.bf16 %v222_v54, %v221_v53  ;;  %v73_v58 = vpop.permute.xlu1 %72  ;;  %v83_v4 = vpop.permute.xlu0 %82  ;;  %v696_v53 = vmov 0.0   ;;  %v698_v54 = vmov 3  }
  0xa3   :  { %v128_v60 = vmul.f32 %v824_v26, %v73_v58  ;;  %v223_v63 = vmax.f32 %v207_v59, 0.0  ;;  %v130_v6 = vmul.f32 %v824_v26, %v83_v4  ;;  %606 = vmatprep.subr.bf16.mxu1 %v696_v53  ;;  %622 = vmatprep.mubr.msk.bf16.mxu1 %vm697_vm0, %v696_v53 }
  0xa4   :  { %578 = vmatprep.subr.bf16.mxu0 %v251_v56  ;;  %652 = vset.pattern.permute.xlu0 %v698_v54 }
  0xa5   :  { %579 = vmatpush3.bf16.msra.mxu0 %v251_v56  ;;  %492 = vperm.xlu0 %652, %v734_v2  }
  0xa6   :  { %v88_v11 = vpop.permute.xlu0 %87 }
  0xa7   :  { %v167_v61 = vpop.permute.xlu1 %166  ;;  %v131_v14 = vmul.f32 %v824_v26, %v88_v11 }
  0xa8   :  { %v208_v62 = vadd.f32 %v167_v61, %v128_v60 }
  0xa9   :  { %v211_v17 = vadd.f32 %v818_v24, %v131_v14 }
  0xaa   :  { %v224_v0 = vmax.f32 %v208_v62, 0.0  ;;  %v103_v27 = vpop.permute.xlu0 %102 }
  0xab   :  { %v227_v21 = vmax.f32 %v211_v17, 0.0  ;;  %v134_v30 = vmul.f32 %v824_v26, %v103_v27 }
  0xac   :  { %v252_v1 = vpack.c.bf16 %v224_v0, %v223_v63  ;;  %v78_v3 = vpop.permute.xlu1 %77 }
  0xad   :  { %v129_v7 = vmul.f32 %v824_v26, %v78_v3 }
  0xae   :  { %580 = vmatprep.subr.bf16.mxu0 %v252_v1  ;;  %v108_v32 = vpop.permute.xlu0 %107 }
  0xaf   :  { %581 = vmatpush3.bf16.msra.mxu0 %v252_v1  ;;  %v135_v36 = vmul.f32 %v824_v26, %v108_v32 }
  0xb1   :  { %v171_v5 = vpop.permute.xlu1 %170 }
  0xb2   :  { %v209_v8 = vadd.f32 %v171_v5, %v129_v7 }
  0xb3   :  { %v195_v39 = vpop.permute.xlu0 %194 }
  0xb4   :  { %v225_v12 = vmax.f32 %v209_v8, 0.0  ;;  %v215_v40 = vadd.f32 %v195_v39, %v135_v36 }
  0xb5   :  { %v175_v9 = vpop.permute.xlu1 %174 }
  0xb6   :  { %v210_v10 = vadd.f32 %v175_v9, %v130_v6  ;;  %v231_v44 = vmax.f32 %v215_v40, 0.0 }
  0xb8   :  { %v226_v13 = vmax.f32 %v210_v10, 0.0  ;;  %v263_v57 = vpop.permute.xlu0 %262 }
  0xba   :  { %v253_v15 = vpack.c.bf16 %v226_v13, %v225_v12  ;;  %v93_v16 = vpop.permute.xlu1 %92 }
  0xbb   :  { %v132_v18 = vmul.f32 %v824_v26, %v93_v16 }
  0xbc   :  { %582 = vmatprep.subr.bf16.mxu0 %v253_v15  ;;  %v275_v59 = vpop.permute.xlu0 %274 }
  0xbd   :  { %583 = vmatpush3.bf16.msra.mxu0 %v253_v15 }
  0xbf   :  { %v183_v19 = vpop.permute.xlu1 %182 }
  0xc0   :  { %v212_v20 = vadd.f32 %v183_v19, %v132_v18  ;;  %v283_v61 = vpop.permute.xlu0 %282 }
  0xc2   :  { %v228_v22 = vmax.f32 %v212_v20, 0.0 }
  0xc4   :  { %v254_v23 = vpack.c.bf16 %v228_v22, %v227_v21  ;;  %v98_v25 = vpop.permute.xlu1 %97  ;;  %v291_v2 = vpop.permute.xlu0 %290 }
  0xc5   :  { %v133_v29 = vmul.f32 %v824_v26, %v98_v25 }
  0xc6   :  { %584 = vmatprep.subr.bf16.mxu0 %v254_v23 }
  0xc7   :  { %585 = vmatpush3.bf16.msra.mxu0 %v254_v23 }
  0xc8   :  { %v299_v16 = vpop.permute.xlu0 %298 }
  0xc9   :  { %v187_v28 = vpop.permute.xlu1 %186 }
  0xca   :  { %v213_v31 = vadd.f32 %v187_v28, %v133_v29 }
  0xcc   :  { %v229_v34 = vmax.f32 %v213_v31, 0.0 }
  0xcd   :  { %v191_v33 = vpop.permute.xlu1 %190 }
  0xce   :  { %v214_v24 = vadd.f32 %v191_v33, %v134_v30  ;;  %v307_v30 = vpop.permute.xlu0 %306 }
  0xd0   :  { %v230_v35 = vmax.f32 %v214_v24, 0.0 }
  0xd2   :  { %v255_v37 = vpack.c.bf16 %v230_v35, %v229_v34  ;;  %v113_v38 = vpop.permute.xlu1 %112  ;;  %v315_v40 = vpop.permute.xlu0 %314 }
  0xd3   :  { %v136_v41 = vmul.f32 %v824_v26, %v113_v38  ;;  %v656_v26 = vld [vmem:[%s882_s2 + $0x18] sm:$0xff]  }
  0xd4   :  { %586 = vmatprep.subr.bf16.mxu0 %v255_v37 }
  0xd5   :  { %587 = vmatpush3.bf16.msra.mxu0 %v255_v37 }
  0xd7   :  { %v199_v42 = vpop.permute.xlu1 %198 }
  0xd8   :  { %v216_v43 = vadd.f32 %v199_v42, %v136_v41 }
  0xda   :  { %v232_v45 = vmax.f32 %v216_v43, 0.0 }
  0xdc   :  { %v256_v46 = vpack.c.bf16 %v232_v45, %v231_v44  ;;  %v259_v55 = vpop.permute.xlu1 %258 }
  0xde   :  { %588 = vmatprep.subr.bf16.mxu0 %v256_v46 }
  0xdf   :  { %589 = vmatpush3.bf16.msra.mxu0 %v256_v46 }
  0xe0   :  { %v267_v56 = vpop.permute.xlu1 %266 }
  0xe2   :  { %591 = vmatmul.mubr.bf16.vlgmr.msra.gmra.mrb[0].mxu0 %v654_v47 }
  0xe3   :  { %594 = vmatprep.mubr.bf16.mxu0 %v655_v48 }
  0xe4   :  { %v271_v58 = vpop.permute.xlu1 %270 }
  0xe8   :  { %v279_v60 = vpop.permute.xlu1 %278 }
  0xea   :  { %595 = vmatmul.mubr.bf16.gmra.mrb[4].mxu0 %v656_v26 }
  0xeb   :  { %598 = vmatprep.mubr.bf16.mxu0 %v657_v49 }
  0xec   :  { %v287_v1 = vpop.permute.xlu1 %286 }
  0xf0   :  { %v295_v8 = vpop.permute.xlu1 %294 }
  0xf2   :  { %599 = vmatmul.mubr.bf16.gmra.mrb[8].mxu0 %v658_v50 }
  0xf3   :  { %602 = vmatprep.mubr.bf16.mxu0 %v659_v51 }
  0xf4   :  { %v303_v20 = vpop.permute.xlu1 %302 }
  0xf8   :  { %v311_v34 = vpop.permute.xlu1 %310 }
  0xfa   :  { %603 = vmatmul.mubr.bf16.gmra.mrb[12].mxu0 %v660_v52 }
  0xfc   :  { %v319_v46 = vpop.permute.xlu1 %318 }
 0x1b5   :  { %v592_v62 = vpop.f32.mrb[0].mxu0 }
 0x1b6   :  { %v412_v63 = vadd.f32 %v592_v62, %v267_v56  ;;  %v403_v0 = vpop.f32.mrb[1].mxu0 }
 0x1b7   :  { %v404_v3 = vadd.f32 %v403_v0, %v259_v55  ;;  %v593_v4 = vpop.f32.mrb[2].mxu0  ;;  %v482_v0 = vld [vmem:[%s884_s3] sm:$0xf] }
 0x1b8   :  { %661 = vtanh.f32 %v412_v63  ;;  %v415_v5 = vadd.f32 %v593_v4, %v271_v58  ;;  %v406_v6 = vpop.f32.mrb[3].mxu0 }
 0x1b9   :  { %663 = vtanh.f32 %v404_v3  ;;  %v407_v7 = vadd.f32 %v406_v6, %v263_v57 }
 0x1ba   :  { %665 = vtanh.f32 %v415_v5 }
 0x1bb   :  { %667 = vtanh.f32 %v407_v7 }
 0x1bd   :  { %v596_v9 = vpop.f32.mrb[4].mxu0 }
 0x1be   :  { %v428_v10 = vadd.f32 %v596_v9, %v283_v61  ;;  %v419_v11 = vpop.f32.mrb[5].mxu0 }
 0x1bf   :  { %v420_v12 = vadd.f32 %v419_v11, %v275_v59  ;;  %v597_v13 = vpop.f32.mrb[6].mxu0 }
 0x1c0   :  { %669 = vtanh.f32 %v428_v10  ;;  %v431_v14 = vadd.f32 %v597_v13, %v287_v1  ;;  %v422_v15 = vpop.f32.mrb[7].mxu0  ;;  %v493_v1 = vpop.permute.xlu0 %492 }
 0x1c1   :  { %671 = vtanh.f32 %v420_v12  ;;  %v423_v17 = vadd.f32 %v422_v15, %v279_v60 }
 0x1c2   :  { %v662_v18 = vpop.eup %661  ;;  %673 = vtanh.f32 %v431_v14 }
 0x1c3   :  { %v664_v19 = vpop.eup %663  ;;  %675 = vtanh.f32 %v423_v17 }
 0x1c4   :  { %v666_v21 = vpop.eup %665 }
 0x1c5   :  { %v668_v22 = vpop.eup %667  ;;  %v600_v23 = vpop.f32.mrb[8].mxu0  ;;  %v484_v25 = vpack.c.bf16 %v666_v21, %v662_v18 }
 0x1c6   :  { %v444_v27 = vadd.f32 %v600_v23, %v299_v16  ;;  %v435_v28 = vpop.f32.mrb[9].mxu0  ;;  %v483_v29 = vpack.c.bf16 %v668_v22, %v664_v19 }
 0x1c7   :  { %v436_v31 = vadd.f32 %v435_v28, %v291_v2  ;;  %v601_v32 = vpop.f32.mrb[10].mxu0 }
 0x1c8   :  { %677 = vtanh.f32 %v444_v27  ;;  %v447_v33 = vadd.f32 %v601_v32, %v303_v20  ;;  %v438_v24 = vpop.f32.mrb[11].mxu0  ;;  %607 = vmatpush3.bf16.msra.mxu1 %v483_v29 }
 0x1c9   :  { %679 = vtanh.f32 %v436_v31  ;;  %v439_v35 = vadd.f32 %v438_v24, %v295_v8  ;;  %608 = vmatprep.subr.bf16.mxu1 %v696_v53 }
 0x1ca   :  { %v670_v36 = vpop.eup %669  ;;  %681 = vtanh.f32 %v447_v33 }
 0x1cb   :  { %v672_v37 = vpop.eup %671  ;;  %683 = vtanh.f32 %v439_v35 }
 0x1cc   :  { %v674_v38 = vpop.eup %673  ;;  %609 = vmatpush3.bf16.msra.mxu1 %v484_v25 }
 0x1cd   :  { %v676_v39 = vpop.eup %675  ;;  %v604_v41 = vpop.f32.mrb[12].mxu0  ;;  %610 = vmatprep.subr.bf16.mxu1 %v696_v53  ;;  %v486_v42 = vpack.c.bf16 %v674_v38, %v670_v36 }
 0x1ce   :  { %v460_v43 = vadd.f32 %v604_v41, %v315_v40  ;;  %v451_v44 = vpop.f32.mrb[13].mxu0  ;;  %v485_v45 = vpack.c.bf16 %v676_v39, %v672_v37 }
 0x1cf   :  { %v452_v47 = vadd.f32 %v451_v44, %v307_v30  ;;  %v605_v48 = vpop.f32.mrb[14].mxu0 }
 0x1d0   :  { %685 = vtanh.f32 %v460_v43  ;;  %v463_v26 = vadd.f32 %v605_v48, %v319_v46  ;;  %v454_v49 = vpop.f32.mrb[15].mxu0  ;;  %611 = vmatpush3.bf16.msra.mxu1 %v485_v45 }
 0x1d1   :  { %687 = vtanh.f32 %v452_v47  ;;  %v455_v50 = vadd.f32 %v454_v49, %v311_v34  ;;  %612 = vmatprep.subr.bf16.mxu1 %v696_v53 }
 0x1d2   :  { %v678_v51 = vpop.eup %677  ;;  %689 = vtanh.f32 %v463_v26 }
 0x1d3   :  { %v680_v52 = vpop.eup %679  ;;  %691 = vtanh.f32 %v455_v50 }
 0x1d4   :  { %v682_v54 = vpop.eup %681  ;;  %613 = vmatpush3.bf16.msra.mxu1 %v486_v42 }
 0x1d5   :  { %v684_v55 = vpop.eup %683  ;;  %614 = vmatprep.subr.bf16.mxu1 %v696_v53  ;;  %v488_v56 = vpack.c.bf16 %v682_v54, %v678_v51 }
 0x1d6   :  { %v487_v57 = vpack.c.bf16 %v684_v55, %v680_v52 }
 0x1d8   :  { %615 = vmatpush3.bf16.msra.mxu1 %v487_v57 }
 0x1d9   :  { %616 = vmatprep.subr.bf16.mxu1 %v696_v53 }
 0x1da   :  { %v686_v58 = vpop.eup %685 }
 0x1db   :  { %v688_v59 = vpop.eup %687 }
 0x1dc   :  { %v690_v60 = vpop.eup %689  ;;  %617 = vmatpush3.bf16.msra.mxu1 %v488_v56 }
 0x1dd   :  { %v692_v61 = vpop.eup %691  ;;  %618 = vmatprep.subr.bf16.mxu1 %v696_v53  ;;  %v490_v62 = vpack.c.bf16 %v690_v60, %v686_v58 }
 0x1de   :  { %v489_v63 = vpack.c.bf16 %v692_v61, %v688_v59 }
 0x1e0   :  { %619 = vmatpush3.bf16.msra.mxu1 %v489_v63 }
 0x1e1   :  { %620 = vmatprep.subr.bf16.mxu1 %v696_v53 }
 0x1e4   :  { %621 = vmatpush3.bf16.msra.mxu1 %v490_v62 }
 0x1e7   :  { %623 = vmatmul.mubr.bf16.vlgmr.msra.gmra.mrb[0].mxu1 %v482_v0 }
 0x2ba   :  { %v529_v3 = vpop.f32.mrb[0].mxu1 }
 0x2bb   :  { %v530_v4 = vadd.f32 %v529_v3, %v493_v1  ;;  %v624_v5 = vpop.f32.mrb[1].mxu1 }
 0x2bc   :  { %v532_v6 = vpop.f32.mrb[2].mxu1 }
 0x2bd   :  { %535 = vst [vmem:[%s885_s4] sm:$0xff] %v530_v4  ;;  %v625_v7 = vpop.f32.mrb[3].mxu1 }

</bundles_post_ra>
